<compile_context>
chip_gen: v5e
topology: v5e:2x2
jax: 0.10.0
libtpu: 0.0.40
codegen_flags: <defaults>
</compile_context>

<pallas_src>
import functools

import jax
import jax.numpy as jnp
from jax.experimental import pallas as pl
from jax.experimental.pallas import tpu as pltpu

HIDDEN_SIZE = 64
HIDDEN_LAYERS = 3
INPUT_DIM = 3                      # module's input_dim
IN_FEATURES = INPUT_DIM + 1        # 3 -> 4 after sin/cos encoding
DEFAULT_TILE_ROWS = 4096           # (64, 4096) f32 activation tile = 1 MiB


def _round_up(a, b):
    return (a + b - 1) // b * b


# ----------------------------------------------------------------------------
# kernels (transposed layout: activations are (features, rows), rows on lanes)
# ----------------------------------------------------------------------------
def _mlp_kernel_enc3(x_ref, w_in_ref, b_in_ref, w_h_ref, b_h_ref,
                     w_out_ref, b_out_ref, o_ref, *, mm_dtype):
    """input_dim == 3 path: x_ref is (3, TM) = [x; y; theta], encoding fused."""
    xt = x_ref[...]                                   # (3, TM) f32, lane-dense
    x0 = xt[0:1, :]                                   # (1, TM)
    x1 = xt[1:2, :]
    th = xt[2:3, :]
    w_in = w_in_ref[...]                              # (H, 4) torch (out, in)
    # input layer: W_in @ [x; y; sin(th); cos(th)] + b_in as broadcast FMAs
    # (VPU) + sin/cos (EUP); no K=4 MXU pass, no 4-row temp in HBM.
    h = (w_in[:, 0:1] * x0
         + w_in[:, 1:2] * x1
         + w_in[:, 2:3] * jnp.sin(th)
         + w_in[:, 3:4] * jnp.cos(th)
         + b_in_ref[...])                             # (H, TM)
    # hidden layers: tanh(W_l @ h + b_l), static unroll (HIDDEN_LAYERS == 3)
    for l in range(HIDDEN_LAYERS):
        h = jnp.tanh(
            jnp.dot(w_h_ref[l].astype(mm_dtype), h.astype(mm_dtype),
                    preferred_element_type=jnp.float32) + b_h_ref[l])
    # output layer: (1, H) @ (H, TM) -> lane-dense (1, TM) row (no activation)
    out = jnp.dot(w_out_ref[...], h,
                  preferred_element_type=jnp.float32) + b_out_ref[...]
    o_ref[...] = out.astype(o_ref.dtype)


def _mlp_kernel_plain(x_ref, w_in_ref, b_in_ref, w_h_ref, b_h_ref,
                      w_out_ref, b_out_ref, o_ref, *, mm_dtype):
    """Generic path (input_dim != 3): plain Linear input layer."""
    h = jnp.dot(w_in_ref[...].astype(mm_dtype), x_ref[...].astype(mm_dtype),
                preferred_element_type=jnp.float32) + b_in_ref[...]
    for l in range(HIDDEN_LAYERS):
        h = jnp.tanh(
            jnp.dot(w_h_ref[l].astype(mm_dtype), h.astype(mm_dtype),
                    preferred_element_type=jnp.float32) + b_h_ref[l])
    out = jnp.dot(w_out_ref[...], h,
                  preferred_element_type=jnp.float32) + b_out_ref[...]
    o_ref[...] = out.astype(o_ref.dtype)


# ----------------------------------------------------------------------------
# params (mimic torch.nn.Linear default init), weights stored torch-style (out, in)
# ----------------------------------------------------------------------------
def init_params(key, in_features=IN_FEATURES, hidden=HIDDEN_SIZE,
                hidden_layers=HIDDEN_LAYERS):
    keys = jax.random.split(key, 2 + hidden_layers)

    def lin(k, fan_in, fan_out):
        kw, kb = jax.random.split(k)
        bound = float(fan_in) ** -0.5
        w = jax.random.uniform(kw, (fan_out, fan_in), jnp.float32, -bound, bound)
        b = jax.random.uniform(kb, (fan_out, 1), jnp.float32, -bound, bound)
        return w, b

    w_in, b_in = lin(keys[0], in_features, hidden)
    whs, bhs = [], []
    for l in range(hidden_layers):
        w, b = lin(keys[1 + l], hidden, hidden)
        whs.append(w[None])                 # (1, H, H)   (out, in)
        bhs.append(b[None])                 # (1, H, 1)
    w_out, b_out = lin(keys[1 + hidden_layers], hidden, 1)   # (1, H), (1, 1)

    return dict(
        w_in=w_in, b_in=b_in,
        w_h=jnp.concatenate(whs, axis=0),   # (L, H, H)
        b_h=jnp.concatenate(bhs, axis=0),   # (L, H, 1)
        w_out=w_out, b_out=b_out,
    )


# ----------------------------------------------------------------------------
# wrappers
# ----------------------------------------------------------------------------
def mlp_reference(x, params):
    """Plain-JAX reference matching the PyTorch forward."""
    if x.shape[-1] == 3:
        sin_cos = jnp.concatenate(
            [jnp.sin(x[..., -1:]), jnp.cos(x[..., -1:])], axis=-1)
        x = jnp.concatenate([x[..., :-1], sin_cos], axis=-1)
    h = x @ params["w_in"].T + params["b_in"][:, 0]
    for l in range(HIDDEN_LAYERS):
        h = jnp.tanh(h @ params["w_h"][l].T + params["b_h"][l, :, 0])
    return h @ params["w_out"].T + params["b_out"][0]


def mlp_forward(x, params, *, tile_rows=DEFAULT_TILE_ROWS, force_pallas=False,
                mm_dtype=jnp.float32):
    input_dim = x.shape[-1]
    lead = x.shape[:-1]
    x2 = x.reshape(-1, input_dim).astype(jnp.float32)
    n = x2.shape[0]

    # Tiny batches: launch / per-step overhead dominates -> plain JAX path.
    if n < 1024 and not force_pallas:
        return mlp_reference(x, params).astype(x.dtype)

    # Lane-dense layout: present the state transposed (input_dim, n) so every
    # activation is (features, rows) with rows mapped to the 128-lane axis.
    xt = x2.T

    # Tile selection:
    #  * small n: one block == full array (no alignment constraint, grid of 1)
    #  * large n: lane-aligned (multiple of 128) tile, capped at tile_rows,
    #    sized so the grid has >= ~4 steps (keeps both v7x TensorCores busy).
    if n <= 1024:
        tm = n
    else:
        tm = min(_round_up(tile_rows, 128), _round_up(pl.cdiv(n, 4), 128))
    num_tiles = pl.cdiv(n, tm)          # ragged last block is masked by Pallas

    fused = (input_dim == 3)
    kernel = functools.partial(
        _mlp_kernel_enc3 if fused else _mlp_kernel_plain, mm_dtype=mm_dtype)
    if not fused:
        assert params["w_in"].shape[1] == input_dim

    w_in, b_in = params["w_in"], params["b_in"]
    w_h, b_h = params["w_h"], params["b_h"]
    w_out, b_out = params["w_out"], params["b_out"]

    in_specs = [
        # state tile: (input_dim, tm), lane-dense; ragged tail reads are masked
        pl.BlockSpec((input_dim, tm), lambda i: (0, i)),
        # weights/biases: constant index_map -> VMEM resident, no re-DMA per tile
        pl.BlockSpec(w_in.shape, lambda i: (0, 0)),
        pl.BlockSpec(b_in.shape, lambda i: (0, 0)),
        pl.BlockSpec(w_h.shape, lambda i: (0, 0, 0)),
        pl.BlockSpec(b_h.shape, lambda i: (0, 0, 0)),
        pl.BlockSpec(w_out.shape, lambda i: (0, 0)),
        pl.BlockSpec(b_out.shape, lambda i: (0, 0)),
    ]
    # lane-dense output: one (1, tm) row block per grid step (no 1-lane masked
    # stores, contiguous writeback DMA); leading grid dim is squeezed.
    out_spec = pl.BlockSpec((None, 1, tm), lambda i: (i, 0, 0))

    H = HIDDEN_SIZE
    in_feats = IN_FEATURES if fused else input_dim
    n_weight_elems = sum(int(p.size) for p in params.values())
    cost = pl.CostEstimate(
        flops=int(2 * n * (in_feats * H + HIDDEN_LAYERS * H * H + H)),
        transcendentals=int(n * (HIDDEN_LAYERS * H + (2 if fused else 0))),
        bytes_accessed=int(4 * (n * (input_dim + 1) + n_weight_elems)),
    )

    out = pl.pallas_call(
        kernel,
        out_shape=jax.ShapeDtypeStruct((num_tiles, 1, tm), jnp.float32),
        grid=(num_tiles,),
        in_specs=in_specs,
        out_specs=out_spec,
        compiler_params=pltpu.CompilerParams(
            dimension_semantics=("parallel",),   # shard row tiles across TCs (v7x)
            vmem_limit_bytes=32 * 1024 * 1024,
        ),
        cost_estimate=cost,
    )(xt, w_in, b_in, w_h, b_h, w_out, b_out)

    out = out.reshape(-1)
    if out.shape[0] != n:
        out = out[:n]                   # drop only the ragged-tail garbage rows
    return out.reshape(*lead, 1).astype(x.dtype)


# ----------------------------------------------------------------------------
# test
# ----------------------------------------------------------------------------
if __name__ == "__main__":
    key = jax.random.PRNGKey(0)
    k_param, k_x1, k_x2 = jax.random.split(key, 3)

    params = init_params(k_param)

    # Small example consistent with the module: batch=2, seq=8, state dim 3.
    x_small = jax.random.normal(k_x1, (2, 8, 3), dtype=jnp.float32)
    y_small = jax.block_until_ready(
        mlp_forward(x_small, params, force_pallas=True))
    y_small_ref = mlp_reference(x_small, params)
    assert y_small.shape == (2, 8, 1)
    assert jnp.allclose(y_small, y_small_ref, atol=1e-5, rtol=1e-5)

    # Larger batch: exercises the multi-tile grid and ragged last-block masking
    # (1250 rows -> 4 tiles of 384 rows, last tile partially out of bounds).
    x_big = jax.random.normal(k_x2, (5, 250, 3), dtype=jnp.float32)
    y_big = jax.block_until_ready(
        mlp_forward(x_big, params, force_pallas=True))
    y_big_ref = mlp_reference(x_big, params)
    assert y_big.shape == (5, 250, 1)
    assert jnp.allclose(y_big, y_big_ref, atol=1e-5, rtol=1e-5)

    # Opt-in bf16 MXU operands (v6e/v7x lever); f32 accumulation, loose check.
    y_bf16 = jax.block_until_ready(
        mlp_forward(x_big, params, force_pallas=True, mm_dtype=jnp.bfloat16))
    assert jnp.max(jnp.abs(y_bf16 - y_big_ref)) < 5e-2

    print("KERNEL_OK")
</pallas_src>

<mosaic_0001>
module attributes {stable_mosaic.version = 11 : i64} {
  func.func @_mlp_kernel_enc3(%arg0: i32, %arg1: memref<3x16xf32, #tpu.memory_space<vmem>>, %arg2: memref<64x4xf32, #tpu.memory_space<vmem>>, %arg3: memref<64x1xf32, #tpu.memory_space<vmem>>, %arg4: memref<3x64x64xf32, #tpu.memory_space<vmem>>, %arg5: memref<3x64x1xf32, #tpu.memory_space<vmem>>, %arg6: memref<1x64xf32, #tpu.memory_space<vmem>>, %arg7: memref<1x1xf32, #tpu.memory_space<vmem>>, %arg8: memref<1x1x16xf32, #tpu.memory_space<vmem>>) attributes {dimension_semantics = [#tpu.dimension_semantics<parallel>], iteration_bounds = array<i64: 1>, scalar_prefetch = 0 : i64, scratch_operands = 0 : i64, tpu.core_type = #tpu.core_type<tc>, window_params = [{transform_indices = @transform_0, window_bounds = array<i64: 3, 16>}, {pipeline_mode = #tpu.pipeline_mode<synchronous>, transform_indices = @transform_1, window_bounds = array<i64: 64, 4>}, {pipeline_mode = #tpu.pipeline_mode<synchronous>, transform_indices = @transform_2, window_bounds = array<i64: 64, 1>}, {pipeline_mode = #tpu.pipeline_mode<synchronous>, transform_indices = @transform_3, window_bounds = array<i64: 3, 64, 64>}, {pipeline_mode = #tpu.pipeline_mode<synchronous>, transform_indices = @transform_4, window_bounds = array<i64: 3, 64, 1>}, {pipeline_mode = #tpu.pipeline_mode<synchronous>, transform_indices = @transform_5, window_bounds = array<i64: 1, 64>}, {pipeline_mode = #tpu.pipeline_mode<synchronous>, transform_indices = @transform_6, window_bounds = array<i64: 1, 1>}, {transform_indices = @transform_7, window_bounds = array<i64: 1, 1, 16>}]} {
    %c0 = arith.constant 0 : index
    %c0_0 = arith.constant 0 : index
    %0 = vector.load %arg1[%c0, %c0_0] : memref<3x16xf32, #tpu.memory_space<vmem>>, vector<3x16xf32>
    %1 = vector.extract_strided_slice %0 {offsets = [0, 0], sizes = [1, 16], strides = [1, 1]} : vector<3x16xf32> to vector<1x16xf32>
    %2 = vector.extract_strided_slice %0 {offsets = [1, 0], sizes = [1, 16], strides = [1, 1]} : vector<3x16xf32> to vector<1x16xf32>
    %3 = vector.extract_strided_slice %0 {offsets = [2, 0], sizes = [1, 16], strides = [1, 1]} : vector<3x16xf32> to vector<1x16xf32>
    %c0_1 = arith.constant 0 : index
    %c0_2 = arith.constant 0 : index
    %4 = vector.load %arg2[%c0_1, %c0_2] : memref<64x4xf32, #tpu.memory_space<vmem>>, vector<64x4xf32>
    %5 = vector.extract_strided_slice %4 {offsets = [0, 0], sizes = [64, 1], strides = [1, 1]} : vector<64x4xf32> to vector<64x1xf32>
    %6 = vector.broadcast %5 : vector<64x1xf32> to vector<64x16xf32>
    %7 = vector.broadcast %1 : vector<1x16xf32> to vector<64x16xf32>
    %8 = arith.mulf %6, %7 : vector<64x16xf32>
    %9 = vector.extract_strided_slice %4 {offsets = [0, 1], sizes = [64, 1], strides = [1, 1]} : vector<64x4xf32> to vector<64x1xf32>
    %10 = vector.broadcast %9 : vector<64x1xf32> to vector<64x16xf32>
    %11 = vector.broadcast %2 : vector<1x16xf32> to vector<64x16xf32>
    %12 = arith.mulf %10, %11 : vector<64x16xf32>
    %13 = arith.addf %8, %12 : vector<64x16xf32>
    %14 = vector.extract_strided_slice %4 {offsets = [0, 2], sizes = [64, 1], strides = [1, 1]} : vector<64x4xf32> to vector<64x1xf32>
    %15 = math.sin %3 : vector<1x16xf32>
    %16 = vector.broadcast %14 : vector<64x1xf32> to vector<64x16xf32>
    %17 = vector.broadcast %15 : vector<1x16xf32> to vector<64x16xf32>
    %18 = arith.mulf %16, %17 : vector<64x16xf32>
    %19 = arith.addf %13, %18 : vector<64x16xf32>
    %20 = vector.extract_strided_slice %4 {offsets = [0, 3], sizes = [64, 1], strides = [1, 1]} : vector<64x4xf32> to vector<64x1xf32>
    %21 = math.cos %3 : vector<1x16xf32>
    %22 = vector.broadcast %20 : vector<64x1xf32> to vector<64x16xf32>
    %23 = vector.broadcast %21 : vector<1x16xf32> to vector<64x16xf32>
    %24 = arith.mulf %22, %23 : vector<64x16xf32>
    %25 = arith.addf %19, %24 : vector<64x16xf32>
    %c0_3 = arith.constant 0 : index
    %c0_4 = arith.constant 0 : index
    %26 = vector.load %arg3[%c0_3, %c0_4] : memref<64x1xf32, #tpu.memory_space<vmem>>, vector<64x1xf32>
    %27 = vector.broadcast %26 : vector<64x1xf32> to vector<64x16xf32>
    %28 = arith.addf %25, %27 : vector<64x16xf32>
    %c0_5 = arith.constant 0 : index
    %c0_6 = arith.constant 0 : index
    %c0_7 = arith.constant 0 : index
    %29 = vector.load %arg4[%c0_5, %c0_6, %c0_7] : memref<3x64x64xf32, #tpu.memory_space<vmem>>, vector<1x64x64xf32>
    %30 = vector.shape_cast %29 : vector<1x64x64xf32> to vector<64x64xf32>
    %cst = arith.constant dense<0.000000e+00> : vector<64x16xf32>
    %31 = tpu.matmul %30, %28, %cst {dimension_numbers = #tpu.dot_dimension_numbers<[1], [0], [0], [1], [0, 0, 1, 1], [], []>} : vector<64x64xf32>, vector<64x16xf32>, vector<64x16xf32> -> vector<64x16xf32>
    %c0_8 = arith.constant 0 : index
    %c0_9 = arith.constant 0 : index
    %c0_10 = arith.constant 0 : index
    %32 = vector.load %arg5[%c0_8, %c0_9, %c0_10] : memref<3x64x1xf32, #tpu.memory_space<vmem>>, vector<1x64x1xf32>
    %33 = vector.shape_cast %32 : vector<1x64x1xf32> to vector<64x1xf32>
    %34 = vector.broadcast %33 : vector<64x1xf32> to vector<64x16xf32>
    %35 = arith.addf %31, %34 : vector<64x16xf32>
    %36 = math.tanh %35 : vector<64x16xf32>
    %c1 = arith.constant 1 : index
    %c0_11 = arith.constant 0 : index
    %c0_12 = arith.constant 0 : index
    %37 = vector.load %arg4[%c1, %c0_11, %c0_12] : memref<3x64x64xf32, #tpu.memory_space<vmem>>, vector<1x64x64xf32>
    %38 = vector.shape_cast %37 : vector<1x64x64xf32> to vector<64x64xf32>
    %cst_13 = arith.constant dense<0.000000e+00> : vector<64x16xf32>
    %39 = tpu.matmul %38, %36, %cst_13 {dimension_numbers = #tpu.dot_dimension_numbers<[1], [0], [0], [1], [0, 0, 1, 1], [], []>} : vector<64x64xf32>, vector<64x16xf32>, vector<64x16xf32> -> vector<64x16xf32>
    %c1_14 = arith.constant 1 : index
    %c0_15 = arith.constant 0 : index
    %c0_16 = arith.constant 0 : index
    %40 = vector.load %arg5[%c1_14, %c0_15, %c0_16] : memref<3x64x1xf32, #tpu.memory_space<vmem>>, vector<1x64x1xf32>
    %41 = vector.shape_cast %40 : vector<1x64x1xf32> to vector<64x1xf32>
    %42 = vector.broadcast %41 : vector<64x1xf32> to vector<64x16xf32>
    %43 = arith.addf %39, %42 : vector<64x16xf32>
    %44 = math.tanh %43 : vector<64x16xf32>
    %c2 = arith.constant 2 : index
    %c0_17 = arith.constant 0 : index
    %c0_18 = arith.constant 0 : index
    %45 = vector.load %arg4[%c2, %c0_17, %c0_18] : memref<3x64x64xf32, #tpu.memory_space<vmem>>, vector<1x64x64xf32>
    %46 = vector.shape_cast %45 : vector<1x64x64xf32> to vector<64x64xf32>
    %cst_19 = arith.constant dense<0.000000e+00> : vector<64x16xf32>
    %47 = tpu.matmul %46, %44, %cst_19 {dimension_numbers = #tpu.dot_dimension_numbers<[1], [0], [0], [1], [0, 0, 1, 1], [], []>} : vector<64x64xf32>, vector<64x16xf32>, vector<64x16xf32> -> vector<64x16xf32>
    %c2_20 = arith.constant 2 : index
    %c0_21 = arith.constant 0 : index
    %c0_22 = arith.constant 0 : index
    %48 = vector.load %arg5[%c2_20, %c0_21, %c0_22] : memref<3x64x1xf32, #tpu.memory_space<vmem>>, vector<1x64x1xf32>
    %49 = vector.shape_cast %48 : vector<1x64x1xf32> to vector<64x1xf32>
    %50 = vector.broadcast %49 : vector<64x1xf32> to vector<64x16xf32>
    %51 = arith.addf %47, %50 : vector<64x16xf32>
    %52 = math.tanh %51 : vector<64x16xf32>
    %c0_23 = arith.constant 0 : index
    %c0_24 = arith.constant 0 : index
    %53 = vector.load %arg6[%c0_23, %c0_24] : memref<1x64xf32, #tpu.memory_space<vmem>>, vector<1x64xf32>
    %cst_25 = arith.constant dense<0.000000e+00> : vector<1x16xf32>
    %54 = tpu.matmul %53, %52, %cst_25 {dimension_numbers = #tpu.dot_dimension_numbers<[1], [0], [0], [1], [0, 0, 1, 1], [], []>} : vector<1x64xf32>, vector<64x16xf32>, vector<1x16xf32> -> vector<1x16xf32>
    %c0_26 = arith.constant 0 : index
    %c0_27 = arith.constant 0 : index
    %55 = vector.load %arg7[%c0_26, %c0_27] : memref<1x1xf32, #tpu.memory_space<vmem>>, vector<1x1xf32>
    %56 = vector.broadcast %55 : vector<1x1xf32> to vector<1x16xf32>
    %57 = arith.addf %54, %56 : vector<1x16xf32>
    %c0_28 = arith.constant 0 : index
    %c0_29 = arith.constant 0 : index
    %c0_30 = arith.constant 0 : index
    %58 = vector.load %arg8[%c0_28, %c0_29, %c0_30] : memref<1x1x16xf32, #tpu.memory_space<vmem>>, vector<1x1x16xf32>
    %59 = vector.shape_cast %58 : vector<1x1x16xf32> to vector<1x16xf32>
    %60 = vector.shape_cast %57 : vector<1x16xf32> to vector<1x1x16xf32>
    tpu.vector_store %arg8[%c0_28, %c0_29, %c0_30], %60 {strides = array<i32>} : memref<1x1x16xf32, #tpu.memory_space<vmem>>, vector<1x1x16xf32>,
    return
  }
  func.func @transform_0(%arg0: i32) -> (i32, i32) {
    %c0_i32 = arith.constant 0 : i32
    %c0_i32_0 = arith.constant 0 : i32
    return %c0_i32, %arg0 : i32, i32
  }
  func.func @transform_1(%arg0: i32) -> (i32, i32) {
    %c0_i32 = arith.constant 0 : i32
    %c0_i32_0 = arith.constant 0 : i32
    %c0_i32_1 = arith.constant 0 : i32
    return %c0_i32, %c0_i32_0 : i32, i32
  }
  func.func @transform_2(%arg0: i32) -> (i32, i32) {
    %c0_i32 = arith.constant 0 : i32
    %c0_i32_0 = arith.constant 0 : i32
    %c0_i32_1 = arith.constant 0 : i32
    return %c0_i32, %c0_i32_0 : i32, i32
  }
  func.func @transform_3(%arg0: i32) -> (i32, i32, i32) {
    %c0_i32 = arith.constant 0 : i32
    %c0_i32_0 = arith.constant 0 : i32
    %c0_i32_1 = arith.constant 0 : i32
    %c0_i32_2 = arith.constant 0 : i32
    return %c0_i32, %c0_i32_0, %c0_i32_1 : i32, i32, i32
  }
  func.func @transform_4(%arg0: i32) -> (i32, i32, i32) {
    %c0_i32 = arith.constant 0 : i32
    %c0_i32_0 = arith.constant 0 : i32
    %c0_i32_1 = arith.constant 0 : i32
    %c0_i32_2 = arith.constant 0 : i32
    return %c0_i32, %c0_i32_0, %c0_i32_1 : i32, i32, i32
  }
  func.func @transform_5(%arg0: i32) -> (i32, i32) {
    %c0_i32 = arith.constant 0 : i32
    %c0_i32_0 = arith.constant 0 : i32
    %c0_i32_1 = arith.constant 0 : i32
    return %c0_i32, %c0_i32_0 : i32, i32
  }
  func.func @transform_6(%arg0: i32) -> (i32, i32) {
    %c0_i32 = arith.constant 0 : i32
    %c0_i32_0 = arith.constant 0 : i32
    %c0_i32_1 = arith.constant 0 : i32
    return %c0_i32, %c0_i32_0 : i32, i32
  }
  func.func @transform_7(%arg0: i32) -> (i32, i32, i32) {
    %c0_i32 = arith.constant 0 : i32
    %c0_i32_0 = arith.constant 0 : i32
    %c0_i32_1 = arith.constant 0 : i32
    return %arg0, %c0_i32, %c0_i32_0 : i32, i32, i32
  }
}

</mosaic_0001>

<bundles_post_ra>
// kernel: tpu_custom_call.1
= control target key start
LH: loop header
LB: loop body
LE: loop exit
PB: predicated region body
PF: predicated region fallthrough
CT: control target
= control target key end

     0   :  { %s1721_s0 = inlined_call_operand.vmem [shape: f32[3,16], index: 0, kind: input, shape index: {}]   ;;  %s1722_s1 = inlined_call_operand.vmem [shape: f32[64,4], index: 1, kind: input, shape index: {}]   ;;  %s1723_s2 = inlined_call_operand.vmem [shape: f32[64,1], index: 2, kind: input, shape index: {}]   ;;  %s1724_s3 = inlined_call_operand.vmem [shape: f32[3,64,64], index: 3, kind: input, shape index: {}]   ;;  %s1725_s4 = inlined_call_operand.vmem [shape: f32[3,64,1], index: 4, kind: input, shape index: {}]   ;;  %s1726_s5 = inlined_call_operand.vmem [shape: f32[1,64], index: 5, kind: input, shape index: {}]   ;;  %s1727_s6 = inlined_call_operand.<no memory space> [shape: f32[1,1], index: 6, kind: input, shape index: {}]   ;;  %s1728_s7 = inlined_call_operand.hbm [shape: f32[1,1,16], index: 7, kind: output, shape index: {}]  }
   0x1   :  { %v12_v0 = vstv %s1727_s6 }
   0x2   :  { %13 = vst [vmem:[#allocation2] sm:$0x1] %v12_v0 }
   0x3   :  { %v1276_v1 = vld [vmem:[%s1722_s1 + $0x38] sm:$0xff]  ;;  %v1281_v2 = vld [vmem:[%s1722_s1 + $0x30] sm:$0xff]  ;;  %v1219_v3 = vmov 2   ;;  %v1220_v4 = vmov 0   ;;  %v1292_v5 = vld [vmem:[%s1721_s0] sm:$0x7] }
   0x4   :  { %1117 = vset.pattern.permute.xlu2 %v1219_v3  ;;  %1115 = vset.pattern.permute.xlu1 %v1220_v4 }
   0x5   :  { %1114 = vset.pattern.permute.xlu0 %v1220_v4  ;;  %320 = vperm.xlu2 %1117, %v1276_v1  }
   0x6   :  { %75 = vperm.xlu0 %1114, %v1276_v1   ;;  %70 = vperm.xlu1 %1115, %v1281_v2  }
   0x7   :  { %14 = vsyncpa [#allocation4], 0  ;;  %v139_v6 = vand.u32 2139095040, %v1292_v5  ;;  %v1298_v8 = vld [vmem:[%s1722_s1 + $0x18] sm:$0xff]  ;;  %v136_v9 = vand.u32 2147483647, %v1292_v5 }
   0x8   :  { %v1304_v10 = vld [vmem:[%s1722_s1 + $0x28] sm:$0xff]  ;;  %v1221_v12 = vmov 1   ;;  %v1316_v17 = vld [vmem:[%s1722_s1 + $0x10] sm:$0xff]  ;;  %v1222_v21 = vmov 683565275   ;;  %v1347_v51 = vld [vmem:[%s1722_s1 + $0x20] sm:$0xff] }
   0x9   :  { %v140_v7 = vshrl.u32 %v139_v6, 23  ;;  %v143_v14 = vand.u32 8388607, %v136_v9  ;;  %v1223_v23 = vmov 2475754826   ;;  %vm138_vm12 = vcmp.lt.s32.totalorder %v1292_v5, 0 }
   0xa   :  { %v1224_v25 = vmov 2131351028   ;;  %v1225_v27 = vmov 2102212464   ;;  %v1226_v29 = vmov 920167782  }
   0xb   :  { %v1040_v11 = vadd.s32 4294967169, %v140_v7  ;;  %v144_v18 = vor.u32 8388608, %v143_v14  ;;  %v1227_v35 = vmov 1326507024   ;;  %vm1439_vm13 = vcmp.le.f32.partialorder %v136_v9, 0.7853982 }
   0xc   :  { %v1064_v9 = vld [vmem:[%s1725_s4 + $0x50] sm:$0xff]  ;;  %s1229_s23 = smov [#allocation3]   ;;  %s1031_s25 = sshll.u32 %s1728_s7, 4  ;;  %s1032_s25 = int_to_ptr.hbm [resolvable:$true] %s1031_s25 }
   0xd   :  { %1118 = vset.pattern.permute.xlu2 %v1220_v4  ;;  %v146_v13 = vadd.s32 1, %v1040_v11  ;;  %v1324_v37 = vshll.u32 %v144_v18, 8  ;;  %s1029_s24 = sshll.u32 %s1229_s23, 4  ;;  %s1030_s24 = int_to_ptr.vmem [resolvable:$true] %s1029_s24 }
   0xe   :  { %1116 = vset.pattern.permute.xlu1 %v1221_v12  ;;  %55 = vperm.xlu0 %1114, %v1298_v8  }
   0xf   :  { %112 = vperm.xlu1 %1116, %v1281_v2   ;;  %65 = vperm.xlu2 %1118, %v1304_v10   ;;  %vm147_vm0 = vcmp.gt.s32.totalorder %v146_v13, 0  ;;  %v185_v49 = vand.u32 65535, %v1324_v37  ;;  %v186_v50 = vshrl.u32 %v1324_v37, 16 }
  0x10   :  { %v148_v15 = vsel %vm147_vm0, %v146_v13, 0 }
  0x11   :  { %v150_v16 = vand.u32 31, %v148_v15  ;;  %v1318_v19 = vshrl.u32 %v148_v15, 5 }
  0x13   :  { %v151_v20 = vsub.s32 32, %v150_v16  ;;  %v153_v22 = vshll.u32 %v1222_v21, %v150_v16  ;;  %v156_v24 = vshll.u32 %v1223_v23, %v150_v16  ;;  %v159_v26 = vshll.u32 %v1224_v25, %v150_v16 }
  0x14   :  { %v162_v28 = vshll.u32 %v1225_v27, %v150_v16  ;;  %v165_v30 = vshll.u32 %v1226_v29, %v150_v16  ;;  %vm168_vm1 = vcmp.lt.s32.totalorder %v1318_v19, 1  ;;  %vm171_vm2 = vcmp.lt.s32.totalorder %v1318_v19, 4  ;;  %v1362_v16 = vld [vmem:[%s1722_s1] sm:$0xff] }
  0x15   :  { %v154_v31 = vshrl.u32 %v1223_v23, %v151_v20  ;;  %v157_v32 = vshrl.u32 %v1224_v25, %v151_v20  ;;  %v160_v33 = vshrl.u32 %v1225_v27, %v151_v20  ;;  %v163_v34 = vshrl.u32 %v1226_v29, %v151_v20 }
  0x16   :  { %50 = vperm.xlu0 %1114, %v1316_v17   ;;  %v166_v36 = vshrl.u32 %v1227_v35, %v151_v20  ;;  %vm170_vm3 = vcmp.lt.s32.totalorder %v1318_v19, 3  ;;  %vm169_vm4 = vcmp.lt.s32.totalorder %v1318_v19, 2  ;;  %v152_v58 = vshrl.u32 %v1222_v21, %v151_v20 }
  0x17   :  { %108 = vperm.xlu1 %1116, %v1304_v10   ;;  %1119 = vset.pattern.permute.xlu2 %v1219_v3  ;;  %v155_v38 = vor.u32 %v154_v31, %v153_v22  ;;  %v158_v39 = vor.u32 %v157_v32, %v156_v24  ;;  %v161_v40 = vor.u32 %v160_v33, %v159_v26 }
  0x18   :  { %316 = vperm.xlu2 %1119, %v1281_v2   ;;  %v164_v41 = vor.u32 %v163_v34, %v162_v28  ;;  %v167_v42 = vor.u32 %v166_v36, %v165_v30  ;;  %v1228_v34 = vmov 3  }
  0x19   :  { %v176_v43 = vsel %vm168_vm1, %v155_v38, %v158_v39  ;;  %v180_v44 = vsel %vm168_vm1, %v158_v39, %v161_v40  ;;  %v172_v18 = vsel %vm168_vm1, %v152_v58, %v155_v38  ;;  %v173_v21 = vsel %vm171_vm2, %v161_v40, 2102212464 }
  0x1a   :  { %v177_v45 = vsel %vm171_vm2, %v164_v41, 920167782  ;;  %v181_v46 = vsel %vm171_vm2, %v167_v42, 1326507024  ;;  %v174_v30 = vsel %vm170_vm3, %v158_v39, %v173_v21 }
  0x1b   :  { %v178_v47 = vsel %vm170_vm3, %v161_v40, %v177_v45  ;;  %v182_v48 = vsel %vm170_vm3, %v164_v41, %v181_v46  ;;  %v175_v41 = vsel %vm169_vm4, %v172_v18, %v174_v30  ;;  %vm279_vm3 = vweird.f32 %v1292_v5  ;;  %v608_v18 = vld [vmem:[%s1725_s4 + $0x8] sm:$0xff] }
  0x1c   :  { %v179_v52 = vsel %vm169_vm4, %v176_v43, %v178_v47  ;;  %v183_v53 = vsel %vm169_vm4, %v180_v44, %v182_v48  ;;  %v229_v44 = vmul.u32 %v1324_v37, %v175_v41 }
  0x1d   :  { %v187_v54 = vand.u32 65535, %v183_v53  ;;  %v188_v55 = vshrl.u32 %v183_v53, 16  ;;  %v209_v56 = vand.u32 65535, %v179_v52  ;;  %v210_v57 = vshrl.u32 %v179_v52, 16  ;;  %v549_v53 = vld [vmem:[%s1723_s2 + $0x30] sm:$0xff] }
  0x1e   :  { %1128 = vset.pattern.permute.xlu0 %v1221_v12 }
  0x1f   :  { %1120 = vset.pattern.permute.xlu1 %v1220_v4  ;;  %116 = vperm.xlu0 %1128, %v1276_v1   ;;  %v189_v59 = vmul.u32 %v187_v54, %v185_v49  ;;  %v190_v60 = vmul.u32 %v188_v55, %v185_v49  ;;  %v191_v61 = vmul.u32 %v187_v54, %v186_v50 }
  0x20   :  { %1121 = vset.pattern.permute.xlu2 %v1221_v12  ;;  %60 = vperm.xlu1 %1120, %v1347_v51   ;;  %v211_v62 = vmul.u32 %v209_v56, %v185_v49  ;;  %v212_v63 = vmul.u32 %v210_v57, %v185_v49  ;;  %v213_v0 = vmul.u32 %v209_v56, %v186_v50 }
  0x21   :  { %104 = vperm.xlu2 %1121, %v1347_v51   ;;  %v192_v6 = vmul.u32 %v188_v55, %v186_v50  ;;  %v193_v7 = vshll.u32 %v190_v60, 16  ;;  %v195_v11 = vshll.u32 %v191_v61, 16  ;;  %v214_v13 = vmul.u32 %v210_v57, %v186_v50 }
  0x22   :  { %v215_v14 = vshll.u32 %v212_v63, 16  ;;  %v217_v15 = vshll.u32 %v213_v0, 16  ;;  %v194_v24 = vshrl.u32 %v190_v60, 16  ;;  %v216_v28 = vshrl.u32 %v212_v63, 16 }
  0x23   :  { %vm197_vm5 = vc.u32 %v189_v59, %v193_v7  ;;  %v199_v20 = vadd.s32 %v193_v7, %v189_v59  ;;  %v196_v31 = vshrl.u32 %v191_v61, 16  ;;  %v218_v35 = vshrl.u32 %v213_v0, 16  ;;  %v610_v59 = vld [vmem:[%s1725_s4 + $0x18] sm:$0xff] }
  0x24   :  { %v198_v22 = vsel %vm197_vm5, 1, %v1220_v4  ;;  %vm219_vm6 = vc.u32 %v211_v62, %v215_v14  ;;  %v221_v23 = vadd.s32 %v215_v14, %v211_v62  ;;  %vm655_vm5 = vcmask 523264  }
  0x25   :  { %v200_v25 = vadd.s32 %v198_v22, %v192_v6  ;;  %vm201_vm7 = vc.u32 %v199_v20, %v195_v11  ;;  %v220_v26 = vsel %vm219_vm6, 1, %v1220_v4  ;;  %v548_v6 = vld [vmem:[%s1723_s2 + $0x28] sm:$0xff]  ;;  %vm1022_vm6 = vcmask 122880  }
  0x26   :  { %v202_v27 = vsel %vm201_vm7, 1, %v1220_v4  ;;  %v222_v29 = vadd.s32 %v220_v26, %v214_v13  ;;  %vm223_vm8 = vc.u32 %v221_v23, %v217_v15  ;;  %v225_v40 = vadd.s32 %v221_v23, %v217_v15  ;;  %v1067_v15 = vld [vmem:[%s1725_s4 + $0x68] sm:$0xff]  ;;  %v547_v23 = vld [vmem:[%s1723_s2 + $0x20] sm:$0xff]  ;;  %v546_v26 = vld [vmem:[%s1723_s2 + $0x18] sm:$0xff] }
  0x27   :  { %88 = vperm.xlu0 %1128, %v1362_v16   ;;  %v204_v32 = vadd.s32 %v202_v27, %v200_v25  ;;  %v224_v33 = vsel %vm223_vm8, 1, %v1220_v4  ;;  %v1093_v27 = vld [vmem:[%s1725_s4 + $0xb8] sm:$0xff] }
  0x28   :  { %1122 = vset.pattern.permute.xlu1 %v1219_v3  ;;  %v226_v36 = vadd.s32 %v224_v33, %v222_v29 }
  0x29   :  { %1123 = vset.pattern.permute.xlu2 %v1228_v34  ;;  %312 = vperm.xlu1 %1122, %v1304_v10   ;;  %v205_v38 = vadd.s32 %v204_v32, %v194_v24 }
  0x2a   :  { %519 = vperm.xlu2 %1123, %v1281_v2   ;;  %v227_v42 = vadd.s32 %v226_v36, %v216_v28  ;;  %v1090_v36 = vld [vmem:[%s1725_s4 + $0xa0] sm:$0xff] }
  0x2b   :  { %v206_v39 = vadd.s32 %v205_v38, %v196_v31 }
  0x2c   :  { %v228_v43 = vadd.s32 %v227_v42, %v218_v35  ;;  %v545_v35 = vld [vmem:[%s1723_s2 + $0x10] sm:$0xff] }
  0x2d   :  { %vm231_vm9 = vc.u32 %v206_v39, %v225_v40  ;;  %v230_v56 = vadd.s32 %v225_v40, %v206_v39  ;;  %v544_v39 = vld [vmem:[%s1723_s2 + $0x8] sm:$0xff] }
  0x2e   :  { %v232_v45 = vadd.s32 1, %v228_v43 }
  0x2f   :  { %1137 = vset.pattern.permute.xlu0 %v1228_v34 }
  0x30   :  { %523 = vperm.xlu0 %1137, %v1276_v1   ;;  %v233_v46 = vsel %vm231_vm9, %v232_v45, %v228_v43  ;;  %v550_v1 = vld [vmem:[%s1723_s2 + $0x38] sm:$0xff] }
  0x31   :  { %1124 = vset.pattern.permute.xlu1 %v1221_v12  ;;  %v234_v2 = vadd.s32 %v233_v46, %v229_v44  ;;  %v614_v46 = vld [vmem:[%s1725_s4 + $0x38] sm:$0xff] }
  0x32   :  { %1125 = vset.pattern.permute.xlu2 %v1219_v3  ;;  %100 = vperm.xlu1 %1124, %v1298_v8  }
  0x33   :  { %308 = vperm.xlu2 %1125, %v1347_v51   ;;  %v235_v19 = vadd.s32 536870912, %v234_v2 }
  0x35   :  { %v1388_v47 = vshrl.u32 %v235_v19, 30 }
  0x37   :  { %v237_v37 = vshll.u32 %v1388_v47, 30  ;;  %v260_v33 = vsub.s32 4, %v1388_v47 }
  0x38   :  { %511 = vperm.xlu0 %1137, %v1347_v51  }
  0x39   :  { %v238_v48 = vsub.s32 %v234_v2, %v237_v37  ;;  %v1087_v2 = vld [vmem:[%s1725_s4 + $0x88] sm:$0xff] }
  0x3a   :  { %1126 = vset.pattern.permute.xlu1 %v1228_v34 }
  0x3b   :  { %1127 = vset.pattern.permute.xlu2 %v1220_v4  ;;  %515 = vperm.xlu1 %1126, %v1304_v10   ;;  %vm239_vm10 = vcmp.lt.s32.totalorder %v238_v48, 0  ;;  %v240_v49 = vsub.s32 0, %v238_v48  ;;  %v31_v10 = vld [vmem:[%s1722_s1 + $0x8] sm:$0xff] }
  0x3c   :  { %588 = vperm.xlu2 %1127, %v550_v1  }
  0x3d   :  { %v241_v50 = vsel %vm239_vm10, %v240_v49, %v238_v48 }
  0x3e   :  { %v242_v51 = vclz %v241_v50 }
  0x40   :  { %507 = vperm.xlu0 %1137, %v1298_v8   ;;  %v1041_v52 = vadd.s32 4294967294, %v242_v51 }
  0x42   :  { %vm1042_vm11 = vcmp.lt.s32.totalorder %v1041_v52, 0 }
  0x43   :  { %1129 = vset.pattern.permute.xlu1 %v1221_v12  ;;  %v245_v54 = vsel %vm1042_vm11, 0, %v1041_v52 }
  0x44   :  { %1130 = vset.pattern.permute.xlu2 %v1219_v3  ;;  %96 = vperm.xlu1 %1129, %v1316_v17   ;;  %v250_v55 = vsub.s32 4294967266, %v245_v54  ;;  %v246_v57 = vsub.s32 32, %v245_v54  ;;  %v247_v60 = vshll.u32 %v238_v48, %v245_v54 }
  0x45   :  { %304 = vperm.xlu2 %1130, %v1298_v8   ;;  %v543_v8 = vld [vmem:[%s1723_s2] sm:$0xff] }
  0x46   :  { %v251_v58 = vadd.s32 127, %v250_v55  ;;  %v248_v61 = vshrl.u32 %v230_v56, %v246_v57  ;;  %v1515_v55 = vperm.slane %v1292_v5, 0 }
  0x48   :  { %499 = vperm.xlu0 %1137, %v31_v10   ;;  %v252_v62 = vshll.u32 %v251_v58, 23  ;;  %v249_v63 = vor.u32 %v248_v61, %v247_v60  ;;  %v611_v60 = vld [vmem:[%s1725_s4 + $0x20] sm:$0xff] }
  0x4a   :  { %v253_v0 = vor.u32 4788187, %v252_v62  ;;  %v256_v11 = vcvt.s32.f32 %v249_v63 }
  0x4c   :  { %1131 = vset.pattern.permute.xlu1 %v1220_v4  ;;  %v254_v7 = vand.u32 2147483647, %v253_v0 }
  0x4d   :  { %1132 = vset.pattern.permute.xlu2 %v1220_v4  ;;  %583 = vperm.xlu1 %1131, %v549_v53   ;;  %v1512_v53 = vperm.slane %v1292_v5, 1 }
  0x4e   :  { %45 = vperm.xlu2 %1132, %v31_v10   ;;  %v257_v13 = vmul.f32 %v256_v11, %v254_v7 }
  0x50   :  { %1144 = vset.pattern.permute.xlu0 %v1220_v4  ;;  %v258_v14 = vxor.u32 2147483648, %v257_v13 }
  0x51   :  { %553 = vperm.xlu0 %1144, %v543_v8  }
  0x52   :  { %v259_v20 = vsel %vm138_vm12, %v258_v14, %v257_v13 }
  0x53   :  { %v262_v22 = vsel %vm1439_vm13, %v1292_v5, %v259_v20 }
  0x55   :  { %1133 = vset.pattern.permute.xlu1 %v1221_v12  ;;  %v607_v12 = vld [vmem:[%s1725_s4] sm:$0xff] }
  0x56   :  { %92 = vperm.xlu1 %1133, %v31_v10   ;;  %1134 = vset.pattern.permute.xlu2 %v1219_v3 }
  0x57   :  { %300 = vperm.xlu2 %1134, %v1316_v17  }
  0x59   :  { %632 = vperm.xlu0 %1144, %v610_v59  }
  0x5e   :  { %1135 = vset.pattern.permute.xlu1 %v1220_v4 }
  0x5f   :  { %578 = vperm.xlu1 %1135, %v548_v6   ;;  %1136 = vset.pattern.permute.xlu2 %v1220_v4  ;;  %v1445_v21 = vpop.permute.xlu2 %320 }
  0x60   :  { %40 = vperm.xlu2 %1136, %v1362_v16  }
  0x61   :  { %617 = vperm.xlu0 %1144, %v607_v12   ;;  %v609_v12 = vld [vmem:[%s1725_s4 + $0x10] sm:$0xff] }
  0x67   :  { %1138 = vset.pattern.permute.xlu1 %v1219_v3 }
  0x68   :  { %296 = vperm.xlu1 %1138, %v31_v10   ;;  %1139 = vset.pattern.permute.xlu2 %v1228_v34  ;;  %v612_v10 = vld [vmem:[%s1725_s4 + $0x28] sm:$0xff] }
  0x69   :  { %774 = vperm.xlu0 %1144, %v1067_v15   ;;  %503 = vperm.xlu2 %1139, %v1316_v17   ;;  %v264_v17 = vmul.f32 %v262_v22, %v262_v22  ;;  %v1459_v25 = vpop.permute.xlu2 %65 }
  0x6b   :  { %v272_v24 = vmul.f32 -0.00019511016, %v264_v17  ;;  %v265_v28 = vmul.f32 -0.001358992, %v264_v17 }
  0x6d   :  { %v273_v29 = vadd.f32 0.008332121, %v272_v24 }
  0x6f   :  { %v274_v32 = vmul.f32 %v273_v29, %v264_v17 }
  0x70   :  { %1140 = vset.pattern.permute.xlu1 %v1220_v4 }
  0x71   :  { %573 = vperm.xlu1 %1140, %v547_v23   ;;  %759 = vperm.xlu0 %1144, %v1064_v9   ;;  %v275_v41 = vadd.f32 -0.16666654, %v274_v32  ;;  %v1068_v32 = vld [vmem:[%s1725_s4 + $0x70] sm:$0xff] }
  0x72   :  { %1141 = vset.pattern.permute.xlu2 %v1219_v3  ;;  %v266_v3 = vadd.f32 0.041655596, %v265_v28  ;;  %v1480_v38 = vpop.permute.xlu2 %316 }
  0x73   :  { %292 = vperm.xlu2 %1141, %v1362_v16   ;;  %v276_v44 = vmul.f32 %v275_v41, %v264_v17  ;;  %v1066_v41 = vld [vmem:[%s1725_s4 + $0x60] sm:$0xff] }
  0x74   :  { %v267_v40 = vmul.f32 %v266_v3, %v264_v17 }
  0x76   :  { %v268_v43 = vadd.f32 -0.4999988, %v267_v40 }
  0x78   :  { %v1467_v30 = vpop.permute.xlu1 %70  ;;  %v1469_v31 = vpop.permute.xlu0 %75  ;;  %v269_v19 = vmul.f32 %v268_v43, %v264_v17  ;;  %v1063_v43 = vld [vmem:[%s1725_s4 + $0x48] sm:$0xff] }
  0x79   :  { %568 = vperm.xlu1 %1140, %v546_v26   ;;  %915 = vperm.xlu0 %1144, %v1093_v27   ;;  %v86_v20 = vmul.f32 %v1515_v55, %v1469_v31  ;;  %v1069_v27 = vld [vmem:[%s1725_s4 + $0x78] sm:$0xff] }
  0x7a   :  { %v270_v50 = vadd.f32 1.0, %v269_v19 }
  0x7b   :  { %1142 = vset.pattern.permute.xlu2 %v1228_v34  ;;  %v105_v48 = vpop.permute.xlu2 %104 }
  0x7c   :  { %495 = vperm.xlu2 %1142, %v1362_v16   ;;  %v261_v16 = vsel %vm138_vm12, %v260_v33, %v1388_v47  ;;  %v277_v47 = vadd.f32 1.0, %v276_v44  ;;  %v287_v8 = vxor.u32 2147483648, %v270_v50  ;;  %v124_v56 = vmul.f32 %v1512_v53, %v105_v48  ;;  %v1092_v48 = vld [vmem:[%s1725_s4 + $0xb0] sm:$0xff] }
  0x7d   :  { %v263_v45 = vsel %vm1439_vm13, 0, %v261_v16  ;;  %v1065_v16 = vld [vmem:[%s1725_s4 + $0x58] sm:$0xff] }
  0x7e   :  { %v280_v37 = vadd.s32 3, %v263_v45  ;;  %v278_v51 = vmul.f32 %v277_v47, %v262_v22  ;;  %v484_v57 = vand.u32 3, %v263_v45 }
  0x80   :  { %v1482_v42 = vpop.permute.xlu0 %55  ;;  %v281_v52 = vand.u32 3, %v280_v37  ;;  %v284_v54 = vxor.u32 2147483648, %v278_v51  ;;  %vm486_vm1 = vcmp.eq.s32.totalorder %v484_v57, 0  ;;  %vm489_vm2 = vcmp.eq.s32.totalorder %v484_v57, 2 }
  0x81   :  { %v1484_v34 = vpop.permute.xlu1 %112  ;;  %563 = vperm.xlu1 %1140, %v545_v35   ;;  %900 = vperm.xlu0 %1144, %v1090_v36   ;;  %vm485_vm4 = vcmp.lt.s32.totalorder %v484_v57, 2  ;;  %v491_v13 = vsel %vm489_vm2, %v287_v8, %v278_v51 }
  0x82   :  { %vm283_vm14 = vcmp.eq.s32.totalorder %v281_v52, 0  ;;  %vm286_vm15 = vcmp.eq.s32.totalorder %v281_v52, 2  ;;  %vm282_vm0 = vcmp.lt.s32.totalorder %v281_v52, 2  ;;  %v488_v11 = vsel %vm486_vm1, %v270_v50, %v284_v54 }
  0x83   :  { %v285_v63 = vsel %vm283_vm14, %v270_v50, %v284_v54  ;;  %v288_v0 = vsel %vm286_vm15, %v287_v8, %v278_v51  ;;  %v492_v22 = vsel %vm485_vm4, %v488_v11, %v491_v13  ;;  %v126_v45 = vmul.f32 %v1512_v53, %v1484_v34  ;;  %v1091_v50 = vld [vmem:[%s1725_s4 + $0xa8] sm:$0xff]  ;;  %v1088_v54 = vld [vmem:[%s1725_s4 + $0x90] sm:$0xff] }
  0x84   :  { %1143 = vset.pattern.permute.xlu2 %v1220_v4  ;;  %v613_v4 = vld [vmem:[%s1725_s4 + $0x30] sm:$0xff]  ;;  %v520_v61 = vpop.permute.xlu2 %519  ;;  %v289_v7 = vsel %vm282_vm0, %v285_v63, %v288_v0  ;;  %v493_v26 = vsel %vm279_vm3, nan, %v492_v22  ;;  %v82_v22 = vmul.f32 %v1515_v55, %v1482_v42 }
  0x85   :  { %558 = vperm.xlu2 %1143, %v544_v39   ;;  %v290_v15 = vsel %vm279_vm3, nan, %v289_v7  ;;  %v1549_v31 = vperm.slane %v493_v26, 2 }
  0x86   :  { %v1540_v24 = vperm.slane %v290_v15, 2 }
  0x87   :  { %v533_v34 = vmul.f32 %v1549_v31, %v520_v61  ;;  %v992_v61 = vld [vmem:[#allocation2] sm:$0x1] }
  0x88   :  { %v1501_v1 = vpop.permute.xlu0 %50  ;;  %v331_v29 = vmul.f32 %v1540_v24, %v1445_v21  ;;  %v330_v19 = vmul.f32 %v1540_v24, %v1480_v38  ;;  %v1089_v38 = vld [vmem:[%s1725_s4 + $0x98] sm:$0xff] }
  0x89   :  { %v1503_v49 = vpop.permute.xlu1 %108  ;;  %652 = vperm.xlu1 %1140, %v614_v46   ;;  %885 = vperm.xlu0 %1144, %v1087_v2   ;;  %v1062_v46 = vld [vmem:[%s1725_s4 + $0x40] sm:$0xff]  ;;  %v85_v2 = vmul.f32 %v1515_v55, %v1467_v30 }
  0x8a   :  { %v125_v57 = vmul.f32 %v1512_v53, %v1503_v49 }
  0x8b   :  { %v134_v47 = vadd.f32 %v126_v45, %v85_v2 }
  0x8d   :  { %647 = vperm.xlu2 %1143, %v613_v4   ;;  %v1538_v9 = vpop.permute.xlu2 %308  ;;  %v338_v51 = vadd.f32 %v330_v19, %v134_v47 }
  0x8f   :  { %v541_v30 = vadd.f32 %v533_v34, %v338_v51 }
  0x91   :  { %v117_v58 = vpop.permute.xlu0 %116  ;;  %642 = vperm.xlu1 %1140, %v612_v10  }
  0x92   :  { %v61_v59 = vpop.permute.xlu1 %60  ;;  %v127_v23 = vmul.f32 %v1512_v53, %v117_v58 }
  0x93   :  { %v83_v62 = vmul.f32 %v1515_v55, %v61_v59  ;;  %v84_v59 = vmul.f32 %v1515_v55, %v1459_v25 }
  0x94   :  { %v135_v28 = vadd.f32 %v127_v23, %v86_v20  ;;  %v328_v20 = vmul.f32 %v1540_v24, %v1538_v9 }
  0x95   :  { %v1522_v6 = vadd.f32 %v124_v56, %v83_v62  ;;  %637 = vperm.xlu2 %1143, %v611_v60   ;;  %v1086_v56 = vld [vmem:[%s1725_s4 + $0x80] sm:$0xff]  ;;  %v133_v62 = vadd.f32 %v125_v57, %v84_v59  ;;  %v602_v57 = vld [vmem:[%s1724_s3 + $0x18] sm:$0xff]  ;;  %v604_v59 = vld [vmem:[%s1724_s3 + $0x28] sm:$0xff] }
  0x96   :  { %v339_v5 = vadd.f32 %v331_v29, %v135_v28  ;;  %v589_v36 = vpop.permute.xlu2 %588 }
  0x97   :  { %v336_v23 = vadd.f32 %v328_v20, %v1522_v6  ;;  %v81_v6 = vmul.f32 %v1515_v55, %v1501_v1 }
  0x99   :  { %627 = vperm.xlu1 %1140, %v609_v12   ;;  %v1528_v14 = vpop.permute.xlu0 %88 }
  0x9b   :  { %v313_v17 = vpop.permute.xlu1 %312 }
  0x9c   :  { %v329_v60 = vmul.f32 %v1540_v24, %v313_v17 }
  0x9d   :  { %622 = vperm.xlu2 %1143, %v608_v18  }
  0x9e   :  { %v337_v12 = vadd.f32 %v329_v60, %v133_v62  ;;  %v605_v60 = vld [vmem:[%s1724_s3 + $0x30] sm:$0xff] }
  0x9f   :  { %v305_v44 = vpop.permute.xlu2 %304 }
  0xa1   :  { %784 = vperm.xlu1 %1140, %v1069_v27  }
  0xa2   :  { %v524_v3 = vpop.permute.xlu0 %523 }
  0xa3   :  { %v534_v33 = vmul.f32 %v1549_v31, %v524_v3  ;;  %v327_v3 = vmul.f32 %v1540_v24, %v305_v44 }
  0xa4   :  { %v101_v35 = vpop.permute.xlu1 %100 }
  0xa5   :  { %779 = vperm.xlu2 %1143, %v1068_v32   ;;  %v542_v40 = vadd.f32 %v534_v33, %v339_v5  ;;  %v123_v17 = vmul.f32 %v1512_v53, %v101_v35 }
  0xa7   :  { %v598_v21 = vadd.f32 %v589_v36, %v542_v40  ;;  %v131_v32 = vadd.f32 %v123_v17, %v82_v22 }
  0xa8   :  { %v46_v4 = vpop.permute.xlu2 %45 }
  0xa9   :  { %769 = vperm.xlu1 %1140, %v1066_v41   ;;  %688 = vmatpush.msra.mxu0 %v598_v21  ;;  %v335_v42 = vadd.f32 %v327_v3, %v131_v32  ;;  %v80_v35 = vmul.f32 %v1515_v55, %v46_v4  ;;  %v120_v21 = vmul.f32 %v1512_v53, %v1528_v14 }
  0xaa   :  { %v512_v49 = vpop.permute.xlu0 %511 }
  0xab   :  { %v531_v25 = vmul.f32 %v1549_v31, %v512_v49 }
  0xad   :  { %764 = vperm.xlu2 %1143, %v1065_v16   ;;  %v516_v39 = vpop.permute.xlu1 %515  ;;  %v539_v27 = vadd.f32 %v531_v25, %v336_v23 }
  0xae   :  { %v532_v63 = vmul.f32 %v1549_v31, %v516_v39 }
  0xb0   :  { %v540_v7 = vadd.f32 %v532_v63, %v337_v12 }
  0xb1   :  { %754 = vperm.xlu1 %1140, %v1063_v43   ;;  %v301_v8 = vpop.permute.xlu2 %300 }
  0xb2   :  { %v508_v28 = vpop.permute.xlu0 %507  ;;  %v326_v16 = vmul.f32 %v1540_v24, %v301_v8  ;;  %v599_v8 = vld [vmem:[%s1724_s3] sm:$0xff] }
  0xb3   :  { %v530_v5 = vmul.f32 %v1549_v31, %v508_v28 }
  0xb5   :  { %749 = vperm.xlu2 %1143, %v1062_v46   ;;  %v538_v41 = vadd.f32 %v530_v5, %v335_v42 }
  0xb6   :  { %v97_v37 = vpop.permute.xlu1 %96 }
  0xb7   :  { %v122_v9 = vmul.f32 %v1512_v53, %v97_v37 }
  0xb9   :  { %910 = vperm.xlu1 %1140, %v1092_v48   ;;  %v130_v44 = vadd.f32 %v122_v9, %v81_v6 }
  0xba   :  { %v41_v0 = vpop.permute.xlu2 %40  ;;  %v500_v19 = vpop.permute.xlu0 %499 }
  0xbb   :  { %v79_v45 = vmul.f32 %v1515_v55, %v41_v0  ;;  %v528_v48 = vmul.f32 %v1549_v31, %v500_v19  ;;  %v334_v14 = vadd.f32 %v326_v16, %v130_v44  ;;  %v1054_v16 = vld [vmem:[%s1724_s3 + $0x40] sm:$0xff]  ;;  %v1056_v44 = vld [vmem:[%s1724_s3 + $0x50] sm:$0xff] }
  0xbc   :  { %v1060_v19 = vld [vmem:[%s1724_s3 + $0x70] sm:$0xff] }
  0xbd   :  { %905 = vperm.xlu2 %1143, %v1091_v50   ;;  %v128_v4 = vadd.f32 %v120_v21, %v79_v45  ;;  %v1057_v45 = vld [vmem:[%s1724_s3 + $0x58] sm:$0xff] }
  0xbf   :  { %v584_v52 = vpop.permute.xlu1 %583 }
  0xc0   :  { %v597_v10 = vadd.f32 %v584_v52, %v541_v30 }
  0xc1   :  { %895 = vperm.xlu1 %1140, %v1089_v38  }
  0xc2   :  { %689 = vmatpush.msra.mxu0 %v597_v10 }
  0xc3   :  { %v504_v15 = vpop.permute.xlu2 %503 }
  0xc4   :  { %v529_v1 = vmul.f32 %v1549_v31, %v504_v15 }
  0xc5   :  { %890 = vperm.xlu2 %1143, %v1088_v54   ;;  %v554_v54 = vpop.permute.xlu0 %553 }
  0xc6   :  { %v537_v51 = vadd.f32 %v529_v1, %v334_v14  ;;  %v1061_v1 = vld [vmem:[%s1724_s3 + $0x78] sm:$0xff] }
  0xc8   :  { %v93_v58 = vpop.permute.xlu1 %92 }
  0xc9   :  { %880 = vperm.xlu1 %1140, %v1086_v56   ;;  %v121_v36 = vmul.f32 %v1512_v53, %v93_v58  ;;  %v601_v56 = vld [vmem:[%s1724_s3 + $0x10] sm:$0xff]  ;;  %v603_v58 = vld [vmem:[%s1724_s3 + $0x20] sm:$0xff] }
  0xcb   :  { %v129_v46 = vadd.f32 %v121_v36, %v80_v35 }
  0xcd   :  { %995 = vperm.xlu2 %1143, %v992_v61   ;;  %v293_v26 = vpop.permute.xlu2 %292  ;;  %v606_v61 = vld [vmem:[%s1724_s3 + $0x38] sm:$0xff]  ;;  %v633_v17 = vpop.permute.xlu0 %632 }
  0xce   :  { %v324_v47 = vmul.f32 %v1540_v24, %v293_v26 }
  0xd0   :  { %v332_v34 = vadd.f32 %v324_v47, %v128_v4 }
  0xd1   :  { %v579_v11 = vpop.permute.xlu1 %578 }
  0xd2   :  { %v596_v13 = vadd.f32 %v579_v11, %v540_v7 }
  0xd4   :  { %690 = vmatpush.msra.mxu0 %v596_v13 }
  0xd5   :  { %v618_v36 = vpop.permute.xlu0 %617 }
  0xd6   :  { %v496_v39 = vpop.permute.xlu2 %495 }
  0xd7   :  { %v527_v53 = vmul.f32 %v1549_v31, %v496_v39  ;;  %v600_v31 = vld [vmem:[%s1724_s3 + $0x8] sm:$0xff] }
  0xd9   :  { %v535_v55 = vadd.f32 %v527_v53, %v332_v34 }
  0xda   :  { %v297_v18 = vpop.permute.xlu1 %296 }
  0xdb   :  { %v325_v40 = vmul.f32 %v1540_v24, %v297_v18  ;;  %v591_v24 = vadd.f32 %v554_v54, %v535_v55 }
  0xdd   :  { %v333_v37 = vadd.f32 %v325_v40, %v129_v46  ;;  %v1058_v46 = vld [vmem:[%s1724_s3 + $0x60] sm:$0xff] }
  0xdf   :  { %v536_v50 = vadd.f32 %v528_v48, %v333_v37  ;;  %v559_v52 = vpop.permute.xlu2 %558 }
  0xe1   :  { %v592_v10 = vadd.f32 %v559_v52, %v536_v50 }
  0xe3   :  { %v574_v29 = vpop.permute.xlu1 %573 }
  0xe4   :  { %v595_v33 = vadd.f32 %v574_v29, %v539_v27 }
  0xe6   :  { %691 = vmatpush.msra.mxu0 %v595_v33 }
  0xe7   :  { %v648_v15 = vpop.permute.xlu2 %647 }
  0xeb   :  { %v569_v43 = vpop.permute.xlu1 %568 }
  0xec   :  { %v594_v2 = vadd.f32 %v569_v43, %v538_v41  ;;  %v1055_v43 = vld [vmem:[%s1724_s3 + $0x48] sm:$0xff] }
  0xee   :  { %692 = vmatpush.msra.mxu0 %v594_v2  ;;  %v1059_v2 = vld [vmem:[%s1724_s3 + $0x68] sm:$0xff] }
  0xef   :  { %v638_v20 = vpop.permute.xlu2 %637 }
  0xf3   :  { %v564_v30 = vpop.permute.xlu1 %563 }
  0xf4   :  { %v593_v38 = vadd.f32 %v564_v30, %v537_v51  ;;  %v775_v30 = vpop.permute.xlu0 %774 }
  0xf6   :  { %693 = vmatpush.msra.mxu0 %v593_v38 }
  0xf7   :  { %v623_v33 = vpop.permute.xlu2 %622 }
  0xf8   :  { %694 = vmatpush.msra.mxu0 %v592_v10 }
  0xfa   :  { %695 = vmatpush.msra.mxu0 %v591_v24 }
  0xfb   :  { %1046 = vmatmul.msk.f32.vlgmr.msra.gmra.mxu0 %vm655_vm5, %v599_v8  ;;  %v653_v13 = vpop.permute.xlu1 %652 }
  0xff   :  { %v780_v50 = vpop.permute.xlu2 %779 }
 0x103   :  { %1047 = vmatmul.msk.f32.gmra.mxu0 %vm655_vm5, %v600_v31  ;;  %v643_v18 = vpop.permute.xlu1 %642 }
 0x107   :  { %v765_v54 = vpop.permute.xlu2 %764 }
 0x10b   :  { %1048 = vmatmul.msk.f32.gmra.mxu0 %vm655_vm5, %v601_v56  ;;  %v628_v29 = vpop.permute.xlu1 %627  ;;  %v760_v56 = vpop.permute.xlu0 %759 }
 0x113   :  { %1049 = vmatmul.msk.f32.gmra.mxu0 %vm655_vm5, %v602_v57  ;;  %v785_v34 = vpop.permute.xlu1 %784 }
 0x11b   :  { %1050 = vmatmul.msk.f32.gmra.mxu0 %vm655_vm5, %v603_v58  ;;  %v770_v55 = vpop.permute.xlu1 %769 }
 0x123   :  { %1051 = vmatmul.msk.f32.gmra.mxu0 %vm655_vm5, %v604_v59  ;;  %v755_v59 = vpop.permute.xlu1 %754 }
 0x12b   :  { %1052 = vmatmul.msk.f32.gmra.mxu0 %vm655_vm5, %v605_v60 }
 0x133   :  { %1053 = vmatmul.msk.f32.gmra.mxu0 %vm655_vm5, %v606_v61 }
 0x178   :  { %v697_v62 = vpop.f32.mrf.mxu0 }
 0x179   :  { %v698_v6 = vadd.f32 %v697_v62, %v618_v36  ;;  %v750_v62 = vpop.permute.xlu2 %749 }
 0x180   :  { %v700_v63 = vpop.f32.mrf.mxu0 }
 0x181   :  { %v701_v9 = vadd.f32 %v700_v63, %v623_v33 }
 0x188   :  { %v703_v0 = vpop.f32.mrf.mxu0 }
 0x189   :  { %v704_v32 = vadd.f32 %v703_v0, %v628_v29 }
 0x190   :  { %v706_v12 = vpop.f32.mrf.mxu0 }
 0x191   :  { %v707_v28 = vadd.f32 %v706_v12, %v633_v17  ;;  %v1084_v17 = vld [vmem:[%s1724_s3 + $0xb0] sm:$0xff] }
 0x198   :  { %v709_v7 = vpop.f32.mrf.mxu0 }
 0x199   :  { %v710_v27 = vadd.f32 %v709_v7, %v638_v20  ;;  %v1080_v20 = vld [vmem:[%s1724_s3 + $0x90] sm:$0xff] }
 0x1a0   :  { %v712_v11 = vpop.f32.mrf.mxu0 }
 0x1a1   :  { %v713_v26 = vadd.f32 %v712_v11, %v643_v18  ;;  %v1079_v18 = vld [vmem:[%s1724_s3 + $0x88] sm:$0xff] }
 0x1a8   :  { %v715_v49 = vpop.f32.mrf.mxu0 }
 0x1a9   :  { %v716_v22 = vadd.f32 %v715_v49, %v648_v15  ;;  %v1078_v15 = vld [vmem:[%s1724_s3 + $0x80] sm:$0xff] }
 0x1b0   :  { %v718_v25 = vpop.f32.mrf.mxu0 }
 0x1b1   :  { %v719_v23 = vadd.f32 %v718_v25, %v653_v13  ;;  %v1081_v25 = vld [vmem:[%s1724_s3 + $0x98] sm:$0xff] }
 0x1b3   :  { %1145 = vtanh.f32 %v719_v23  ;;  %v1083_v23 = vld [vmem:[%s1724_s3 + $0xa8] sm:$0xff] }
 0x1b4   :  { %1147 = vtanh.f32 %v716_v22  ;;  %v1082_v22 = vld [vmem:[%s1724_s3 + $0xa0] sm:$0xff] }
 0x1b5   :  { %1149 = vtanh.f32 %v713_v26  ;;  %v1085_v26 = vld [vmem:[%s1724_s3 + $0xb8] sm:$0xff] }
 0x1b6   :  { %1151 = vtanh.f32 %v710_v27 }
 0x1b7   :  { %1153 = vtanh.f32 %v707_v28 }
 0x1b8   :  { %1155 = vtanh.f32 %v704_v32 }
 0x1b9   :  { %v1146_v3 = vpop.eup %1145  ;;  %1157 = vtanh.f32 %v701_v9  ;;  %v911_v9 = vpop.permute.xlu1 %910 }
 0x1ba   :  { %819 = vmatpush.msra.mxu1 %v1146_v3  ;;  %v1148_v5 = vpop.eup %1147  ;;  %1159 = vtanh.f32 %v698_v6 }
 0x1bb   :  { %v1150_v42 = vpop.eup %1149 }
 0x1bc   :  { %820 = vmatpush.msra.mxu1 %v1148_v5  ;;  %v1152_v35 = vpop.eup %1151  ;;  %v916_v5 = vpop.permute.xlu0 %915 }
 0x1bd   :  { %v1154_v40 = vpop.eup %1153 }
 0x1be   :  { %821 = vmatpush.msra.mxu1 %v1150_v42  ;;  %v1156_v41 = vpop.eup %1155  ;;  %v906_v42 = vpop.permute.xlu2 %905 }
 0x1bf   :  { %v1158_v21 = vpop.eup %1157 }
 0x1c0   :  { %822 = vmatpush.msra.mxu1 %v1152_v35  ;;  %v1160_v39 = vpop.eup %1159 }
 0x1c2   :  { %823 = vmatpush.msra.mxu1 %v1154_v40 }
 0x1c4   :  { %824 = vmatpush.msra.mxu1 %v1156_v41  ;;  %v901_v6 = vpop.permute.xlu0 %900 }
 0x1c6   :  { %825 = vmatpush.msra.mxu1 %v1158_v21  ;;  %v896_v21 = vpop.permute.xlu1 %895 }
 0x1c8   :  { %826 = vmatpush.msra.mxu1 %v1160_v39 }
 0x1c9   :  { %1070 = vmatmul.msk.f32.vlgmr.msra.gmra.mxu1 %vm655_vm5, %v1054_v16 }
 0x1d1   :  { %1071 = vmatmul.msk.f32.gmra.mxu1 %vm655_vm5, %v1055_v43 }
 0x1d9   :  { %1072 = vmatmul.msk.f32.gmra.mxu1 %vm655_vm5, %v1056_v44  ;;  %v891_v44 = vpop.permute.xlu2 %890 }
 0x1e1   :  { %1073 = vmatmul.msk.f32.gmra.mxu1 %vm655_vm5, %v1057_v45 }
 0x1e9   :  { %1074 = vmatmul.msk.f32.gmra.mxu1 %vm655_vm5, %v1058_v46 }
 0x1f1   :  { %1075 = vmatmul.msk.f32.gmra.mxu1 %vm655_vm5, %v1059_v2  ;;  %v886_v2 = vpop.permute.xlu0 %885 }
 0x1f9   :  { %1076 = vmatmul.msk.f32.gmra.mxu1 %vm655_vm5, %v1060_v19 }
 0x201   :  { %1077 = vmatmul.msk.f32.gmra.mxu1 %vm655_vm5, %v1061_v1 }
 0x246   :  { %v828_v47 = vpop.f32.mrf.mxu1 }
 0x247   :  { %v829_v0 = vadd.f32 %v828_v47, %v750_v62  ;;  %v881_v47 = vpop.permute.xlu1 %880 }
 0x24e   :  { %v831_v37 = vpop.f32.mrf.mxu1 }
 0x24f   :  { %v832_v61 = vadd.f32 %v831_v37, %v755_v59 }
 0x256   :  { %v834_v48 = vpop.f32.mrf.mxu1 }
 0x257   :  { %v835_v58 = vadd.f32 %v834_v48, %v760_v56 }
 0x25e   :  { %v837_v4 = vpop.f32.mrf.mxu1 }
 0x25f   :  { %v838_v31 = vadd.f32 %v837_v4, %v765_v54 }
 0x266   :  { %v840_v53 = vpop.f32.mrf.mxu1 }
 0x267   :  { %v841_v8 = vadd.f32 %v840_v53, %v770_v55 }
 0x26e   :  { %v843_v14 = vpop.f32.mrf.mxu1 }
 0x26f   :  { %v844_v24 = vadd.f32 %v843_v14, %v775_v30  ;;  %v996_v30 = vpop.permute.xlu2 %995 }
 0x270   :  { %v998_v55 = vperm.slane %v996_v30, 0 }
 0x276   :  { %v846_v51 = vpop.f32.mrf.mxu1 }
 0x277   :  { %v847_v52 = vadd.f32 %v846_v51, %v780_v50  ;;  %v991_v50 = vld [vmem:[%s1726_s5] sm:$0x1] }
 0x27e   :  { %v849_v38 = vpop.f32.mrf.mxu1 }
 0x27f   :  { %v850_v10 = vadd.f32 %v849_v38, %v785_v34 }
 0x281   :  { %1161 = vtanh.f32 %v850_v10 }
 0x282   :  { %1163 = vtanh.f32 %v847_v52 }
 0x283   :  { %1165 = vtanh.f32 %v844_v24 }
 0x284   :  { %1167 = vtanh.f32 %v841_v8 }
 0x285   :  { %1169 = vtanh.f32 %v838_v31 }
 0x286   :  { %1171 = vtanh.f32 %v835_v58 }
 0x287   :  { %v1162_v57 = vpop.eup %1161  ;;  %1173 = vtanh.f32 %v832_v61 }
 0x288   :  { %950 = vmatpush.msra.mxu2 %v1162_v57  ;;  %v1164_v60 = vpop.eup %1163  ;;  %1175 = vtanh.f32 %v829_v0 }
 0x289   :  { %v1166_v63 = vpop.eup %1165 }
 0x28a   :  { %951 = vmatpush.msra.mxu2 %v1164_v60  ;;  %v1168_v12 = vpop.eup %1167 }
 0x28b   :  { %v1170_v7 = vpop.eup %1169 }
 0x28c   :  { %952 = vmatpush.msra.mxu2 %v1166_v63  ;;  %v1172_v11 = vpop.eup %1171 }
 0x28d   :  { %v1174_v13 = vpop.eup %1173 }
 0x28e   :  { %953 = vmatpush.msra.mxu2 %v1168_v12  ;;  %v1176_v49 = vpop.eup %1175 }
 0x290   :  { %954 = vmatpush.msra.mxu2 %v1170_v7 }
 0x292   :  { %955 = vmatpush.msra.mxu2 %v1172_v11 }
 0x294   :  { %956 = vmatpush.msra.mxu2 %v1174_v13 }
 0x296   :  { %957 = vmatpush.msra.mxu2 %v1176_v49 }
 0x297   :  { %1094 = vmatmul.msk.f32.vlgmr.msra.gmra.mxu2 %vm655_vm5, %v1078_v15 }
 0x29f   :  { %1095 = vmatmul.msk.f32.gmra.mxu2 %vm655_vm5, %v1079_v18 }
 0x2a7   :  { %1096 = vmatmul.msk.f32.gmra.mxu2 %vm655_vm5, %v1080_v20 }
 0x2af   :  { %1097 = vmatmul.msk.f32.gmra.mxu2 %vm655_vm5, %v1081_v25 }
 0x2b7   :  { %1098 = vmatmul.msk.f32.gmra.mxu2 %vm655_vm5, %v1082_v22 }
 0x2bf   :  { %1099 = vmatmul.msk.f32.gmra.mxu2 %vm655_vm5, %v1083_v23 }
 0x2c7   :  { %1100 = vmatmul.msk.f32.gmra.mxu2 %vm655_vm5, %v1084_v17 }
 0x2cf   :  { %1101 = vmatmul.msk.f32.gmra.mxu2 %vm655_vm5, %v1085_v26 }
 0x31a   :  { %v959_v27 = vpop.f32.mrf.mxu2 }
 0x31b   :  { %v960_v48 = vadd.f32 %v959_v27, %v881_v47 }
 0x322   :  { %v962_v28 = vpop.f32.mrf.mxu2 }
 0x323   :  { %v963_v1 = vadd.f32 %v962_v28, %v886_v2 }
 0x32a   :  { %v965_v29 = vpop.f32.mrf.mxu2 }
 0x32b   :  { %v966_v46 = vadd.f32 %v965_v29, %v891_v44 }
 0x332   :  { %v968_v3 = vpop.f32.mrf.mxu2 }
 0x333   :  { %v969_v43 = vadd.f32 %v968_v3, %v896_v21 }
 0x33a   :  { %v971_v32 = vpop.f32.mrf.mxu2 }
 0x33b   :  { %v972_v39 = vadd.f32 %v971_v32, %v901_v6 }
 0x342   :  { %v974_v33 = vpop.f32.mrf.mxu2 }
 0x343   :  { %v975_v16 = vadd.f32 %v974_v33, %v906_v42 }
 0x34a   :  { %v977_v36 = vpop.f32.mrf.mxu2 }
 0x34b   :  { %v978_v40 = vadd.f32 %v977_v36, %v911_v9 }
 0x352   :  { %v980_v35 = vpop.f32.mrf.mxu2 }
 0x353   :  { %v981_v41 = vadd.f32 %v980_v35, %v916_v5 }
 0x355   :  { %1177 = vtanh.f32 %v981_v41 }
 0x356   :  { %1179 = vtanh.f32 %v978_v40 }
 0x357   :  { %1181 = vtanh.f32 %v975_v16 }
 0x358   :  { %1183 = vtanh.f32 %v972_v39 }
 0x359   :  { %1185 = vtanh.f32 %v969_v43 }
 0x35a   :  { %1187 = vtanh.f32 %v966_v46 }
 0x35b   :  { %v1178_v45 = vpop.eup %1177  ;;  %1189 = vtanh.f32 %v963_v1 }
 0x35c   :  { %1010 = vmatpush.msra.mxu3 %v1178_v45  ;;  %v1180_v19 = vpop.eup %1179  ;;  %1191 = vtanh.f32 %v960_v48 }
 0x35d   :  { %v1182_v37 = vpop.eup %1181 }
 0x35e   :  { %1011 = vmatpush.msra.mxu3 %v1180_v19  ;;  %v1184_v4 = vpop.eup %1183 }
 0x35f   :  { %v1186_v53 = vpop.eup %1185 }
 0x360   :  { %1012 = vmatpush.msra.mxu3 %v1182_v37  ;;  %v1188_v14 = vpop.eup %1187 }
 0x361   :  { %v1190_v34 = vpop.eup %1189 }
 0x362   :  { %1013 = vmatpush.msra.mxu3 %v1184_v4  ;;  %v1192_v51 = vpop.eup %1191 }
 0x364   :  { %1014 = vmatpush.msra.mxu3 %v1186_v53 }
 0x366   :  { %1015 = vmatpush.msra.mxu3 %v1188_v14 }
 0x368   :  { %1016 = vmatpush.msra.mxu3 %v1190_v34 }
 0x36a   :  { %1017 = vmatpush.msra.mxu3 %v1192_v51 }
 0x36b   :  { %1102 = vmatmul.msk.f32.vlgmr.msra.gmra.mxu3 %vm655_vm5, %v991_v50 }
 0x3ee   :  { %v1019_v38 = vpop.f32.mrf.mxu3 }
 0x3ef   :  { %v1020_v52 = vadd.f32 %v1019_v38, %v998_v55 }
 0x3f1   :  { %1023 = vst.msk [vmem:[#allocation3] sm:$0x1] %vm1022_vm6, %v1020_v52 }
 0x3f2   :  { %1034 = dma.vmem_to_hbm [thread:$0]  %s1030_s24, 16, %s1032_s25, [#allocation4]  }
 0x3f3   :  { %1217 = dma.done.wait [#allocation4], 16  }
 0x3f4   :  { %1218 = vsyncadd [#allocation4], 4294967280 }
 0x3f5   :  { %1039 = vsyncpa [#allocation4], 1 }

</bundles_post_ra>
